<compile_context>
chip_gen: v5e
topology: v5e:2x2
jax: 0.10.0
libtpu: 0.0.40
codegen_flags: <defaults>
</compile_context>

<pallas_src>
import functools

import jax
import jax.numpy as jnp
from jax.experimental import pallas as pl
from jax.experimental.pallas import tpu as pltpu

_LANE = 128            # vreg lane width
_SUBLANE = 8           # vreg sublane count
_DEFAULT_TB = 2048     # default max batch-tile rows (amortizes ~0.35 us/step overhead)
_MIN_GRID_STEPS = 4    # >=4 (even) grid steps when B is large: 2 TCs x >=2 steps
_VPU_L1_MAX_OBS = 16   # layer-1 on the VPU when the contraction dim is this small
_VMEM_TILE_BUDGET = 20 * 1024 * 1024   # bytes allowed for batch-tiled buffers
_VMEM_LIMIT_BYTES = 32 * 1024 * 1024   # scoped VMEM limit handed to Mosaic


def _round_up(x, m):
    return ((x + m - 1) // m) * m


def _qnet_kernel(x_ref, w1_ref, b1_ref, w2_ref, b2_ref, w3_ref, b3_ref, o_ref):
    """Forward pass for one batch tile, fully resident in VMEM.

    x_ref : (TB, obs_dims)                f32
    w1_ref: (obs_dims, 128)  b1_ref: (1, 128)     (hidden 120 padded -> 128)
    w2_ref: (128, 128)       b2_ref: (1, 128)     (hidden 84  padded -> 128)
    w3_ref: (128, ACT_PAD)   b3_ref: (1, ACT_PAD) (action_dims padded -> 128)
    o_ref : (TB, ACT_PAD)                 f32
    Weights may be bf16 (matmul_dtype); biases and accumulation are always f32.
    """
    tb, obs = x_ref.shape
    h1p = w1_ref.shape[1]
    mm_dtype = w1_ref.dtype

    if obs <= _VPU_L1_MAX_OBS:
        # Layer 1 on the VPU: obs broadcast multiply-adds over the (tb, 128) tile.
        # With K=obs<=16 the MXU would be <=16/256 utilized while each 8-row LHS
        # vreg still costs a full vmatmul slot.
        xf = x_ref[...].astype(jnp.float32)
        w1 = w1_ref[...].astype(jnp.float32)
        h1 = jnp.broadcast_to(b1_ref[...], (tb, h1p))
        for k in range(obs):                      # static unroll (obs is tiny)
            h1 = h1 + xf[:, k:k + 1] * w1[k:k + 1, :]
    else:
        h1 = (jnp.dot(x_ref[...].astype(mm_dtype), w1_ref[...],
                      preferred_element_type=jnp.float32) + b1_ref[...])
    h1 = jnp.maximum(h1, 0.0)

    h2 = (jnp.dot(h1.astype(mm_dtype), w2_ref[...],
                  preferred_element_type=jnp.float32) + b2_ref[...])
    h2 = jnp.maximum(h2, 0.0)

    o_ref[...] = (jnp.dot(h2.astype(mm_dtype), w3_ref[...],
                          preferred_element_type=jnp.float32)
                  + b3_ref[...]).astype(o_ref.dtype)


def prepare_qnetwork_params(params, matmul_dtype=jnp.float32):
    """Pad hidden dims (120, 84) and action_dims up to the 128-lane width.

    Call ONCE at init / after each parameter update (hoisted out of the forward
    path). Padded lanes carry zero weight and zero bias, so bias(0) -> ReLU(0)=0
    -> zero rows of the next weight: math unchanged; padded output lanes are
    sliced off in the wrapper. `matmul_dtype=jnp.bfloat16` optionally quantizes
    the matmul inputs (f32 accumulation kept) -- needs accuracy sign-off.
    Returns (padded_params, action_dims).
    """
    w1, b1, w2, b2, w3, b3 = params
    h1, h2, act = w1.shape[1], w2.shape[1], w3.shape[1]
    h1p, h2p, actp = (_round_up(d, _LANE) for d in (h1, h2, act))
    w1p = jnp.pad(w1, ((0, 0), (0, h1p - h1))).astype(matmul_dtype)
    b1p = jnp.pad(b1, ((0, 0), (0, h1p - h1))).astype(jnp.float32)
    w2p = jnp.pad(w2, ((0, h1p - h1), (0, h2p - h2))).astype(matmul_dtype)
    b2p = jnp.pad(b2, ((0, 0), (0, h2p - h2))).astype(jnp.float32)
    w3p = jnp.pad(w3, ((0, h2p - h2), (0, actp - act))).astype(matmul_dtype)
    b3p = jnp.pad(b3, ((0, 0), (0, actp - act))).astype(jnp.float32)
    return (w1p, b1p, w2p, b2p, w3p, b3p), act


def _select_batch_tile(B, obs_dims, act_pad, x_itemsize, block_b):
    """Pick a batch tile that fits the VMEM budget and feeds both TCs on v7x."""
    # Per-row VMEM bytes: double-buffered x tile + double-buffered padded out
    # tile + f32 h1/h2 intermediates. Weights (~0.3 MiB) fit in the headroom.
    per_row = 2 * obs_dims * x_itemsize + 2 * act_pad * 4 + 2 * _LANE * 4
    cap = max(_SUBLANE, (_VMEM_TILE_BUDGET // per_row) // _SUBLANE * _SUBLANE)

    if block_b is not None:
        tb = _round_up(int(block_b), _SUBLANE)
    elif B <= _DEFAULT_TB:
        tb = B                                   # single full tile
    else:
        # Even number of grid steps >= 4 so v7x's two TensorCores each get >=2
        # pipelined steps (x DMA / writeback overlap per core).
        n_steps = max(_MIN_GRID_STEPS, pl.cdiv(B, _DEFAULT_TB))
        n_steps += n_steps % 2
        tb = _round_up(pl.cdiv(B, n_steps), _SUBLANE)

    tb = min(tb, cap)
    if tb >= B:
        tb = B
    return tb


@functools.partial(jax.jit, static_argnames=("action_dims", "block_b"))
def qnetwork_forward(x, padded_params, *, action_dims, block_b=None):
    """Pallas forward: x (B, obs_dims) f32 -> (B, action_dims) f32.

    `padded_params` must come from prepare_qnetwork_params().
    """
    w1, b1, w2, b2, w3, b3 = padded_params
    B, obs_dims = x.shape
    h1p, h2p, act_pad = w1.shape[1], w2.shape[1], w3.shape[1]

    tb = _select_batch_tile(B, obs_dims, act_pad, x.dtype.itemsize, block_b)
    grid = (pl.cdiv(B, tb),)

    def whole(shape):  # weights/biases are tiny: load full tensors every tile
        return pl.BlockSpec(shape, lambda i: (0,) * len(shape))

    out = pl.pallas_call(
        _qnet_kernel,
        out_shape=jax.ShapeDtypeStruct((B, act_pad), jnp.float32),
        grid_spec=pltpu.PrefetchScalarGridSpec(
            num_scalar_prefetch=0,
            grid=grid,
            in_specs=[
                pl.BlockSpec((tb, obs_dims), lambda i: (i, 0)),   # x batch tile
                whole((obs_dims, h1p)),
                whole((1, h1p)),
                whole((h1p, h2p)),
                whole((1, h2p)),
                whole((h2p, act_pad)),
                whole((1, act_pad)),
            ],
            out_specs=pl.BlockSpec((tb, act_pad), lambda i: (i, 0)),
        ),
        compiler_params=pltpu.CompilerParams(
            dimension_semantics=("parallel",),     # batch tiles are independent
            vmem_limit_bytes=_VMEM_LIMIT_BYTES,
        ),
    )(x, w1, b1, w2, b2, w3, b3)
    # Drop the zero-padded action lanes (kept lane-dense inside the kernel so
    # the store path is full unmasked vst + a dense writeback DMA).
    return out[:, :action_dims]


def init_qnetwork_params(key, obs_dims, action_dims):
    """PyTorch nn.Linear-style init: U(-1/sqrt(fan_in), 1/sqrt(fan_in))."""
    dims = [(obs_dims, 120), (120, 84), (84, action_dims)]
    params = []
    for fan_in, fan_out in dims:
        key, kw, kb = jax.random.split(key, 3)
        bound = 1.0 / jnp.sqrt(jnp.float32(fan_in))
        w = jax.random.uniform(kw, (fan_in, fan_out), jnp.float32, -bound, bound)
        b = jax.random.uniform(kb, (1, fan_out), jnp.float32, -bound, bound)
        params += [w, b]
    return tuple(params)


def qnetwork_reference(x, params):
    """Pure-JAX reference (exact f32 matmuls) for correctness checking."""
    w1, b1, w2, b2, w3, b3 = params
    dot = functools.partial(jnp.dot, precision=jax.lax.Precision.HIGHEST)
    h = jnp.maximum(dot(x, w1) + b1, 0.0)
    h = jnp.maximum(dot(h, w2) + b2, 0.0)
    return dot(h, w3) + b3


if __name__ == "__main__":
    key = jax.random.PRNGKey(0)
    B, obs_dims, action_dims = 2, 8, 4

    key, kx, kp = jax.random.split(key, 3)
    x = jax.random.normal(kx, (B, obs_dims), jnp.float32)
    params = init_qnetwork_params(kp, obs_dims, action_dims)
    padded_params, act = prepare_qnetwork_params(params)   # once, at init time

    # Small batch: single full tile, VPU layer-1 path, lane-dense padded output.
    out = jax.block_until_ready(qnetwork_forward(x, padded_params, action_dims=act))
    ref = qnetwork_reference(x, params)
    assert out.shape == (B, action_dims), out.shape
    assert jnp.allclose(out, ref, atol=1e-4, rtol=1e-4), (out, ref)

    # Larger batch with explicit tiling: multiple pipelined grid steps plus a
    # masked partial last tile (300 = 2*128 + 44).
    x2 = jax.random.normal(jax.random.PRNGKey(1), (300, obs_dims), jnp.float32)
    out2 = jax.block_until_ready(
        qnetwork_forward(x2, padded_params, action_dims=act, block_b=128))
    ref2 = qnetwork_reference(x2, params)
    assert out2.shape == (300, action_dims), out2.shape
    assert jnp.allclose(out2, ref2, atol=1e-4, rtol=1e-4)

    print("KERNEL_OK")
</pallas_src>

<mosaic_0001>
module attributes {stable_mosaic.version = 11 : i64} {
  func.func @_qnet_kernel(%arg0: i32, %arg1: memref<2x8xf32, #tpu.memory_space<vmem>>, %arg2: memref<8x128xf32, #tpu.memory_space<vmem>>, %arg3: memref<1x128xf32, #tpu.memory_space<vmem>>, %arg4: memref<128x128xf32, #tpu.memory_space<vmem>>, %arg5: memref<1x128xf32, #tpu.memory_space<vmem>>, %arg6: memref<128x128xf32, #tpu.memory_space<vmem>>, %arg7: memref<1x128xf32, #tpu.memory_space<vmem>>, %arg8: memref<2x128xf32, #tpu.memory_space<vmem>>) attributes {dimension_semantics = [#tpu.dimension_semantics<parallel>], iteration_bounds = array<i64: 1>, scalar_prefetch = 0 : i64, scratch_operands = 0 : i64, tpu.core_type = #tpu.core_type<tc>, window_params = [{transform_indices = @transform_0, window_bounds = array<i64: 2, 8>}, {pipeline_mode = #tpu.pipeline_mode<synchronous>, transform_indices = @transform_1, window_bounds = array<i64: 8, 128>}, {pipeline_mode = #tpu.pipeline_mode<synchronous>, transform_indices = @transform_2, window_bounds = array<i64: 1, 128>}, {pipeline_mode = #tpu.pipeline_mode<synchronous>, transform_indices = @transform_3, window_bounds = array<i64: 128, 128>}, {pipeline_mode = #tpu.pipeline_mode<synchronous>, transform_indices = @transform_4, window_bounds = array<i64: 1, 128>}, {pipeline_mode = #tpu.pipeline_mode<synchronous>, transform_indices = @transform_5, window_bounds = array<i64: 128, 128>}, {pipeline_mode = #tpu.pipeline_mode<synchronous>, transform_indices = @transform_6, window_bounds = array<i64: 1, 128>}, {transform_indices = @transform_7, window_bounds = array<i64: 2, 128>}]} {
    %c0 = arith.constant 0 : index
    %c0_0 = arith.constant 0 : index
    %0 = vector.load %arg1[%c0, %c0_0] : memref<2x8xf32, #tpu.memory_space<vmem>>, vector<2x8xf32>
    %c0_1 = arith.constant 0 : index
    %c0_2 = arith.constant 0 : index
    %1 = vector.load %arg2[%c0_1, %c0_2] : memref<8x128xf32, #tpu.memory_space<vmem>>, vector<8x128xf32>
    %c0_3 = arith.constant 0 : index
    %c0_4 = arith.constant 0 : index
    %2 = vector.load %arg3[%c0_3, %c0_4] : memref<1x128xf32, #tpu.memory_space<vmem>>, vector<1x128xf32>
    %3 = vector.shape_cast %2 : vector<1x128xf32> to vector<1x128xf32>
    %4 = vector.broadcast %3 : vector<1x128xf32> to vector<2x128xf32>
    %5 = vector.extract_strided_slice %0 {offsets = [0, 0], sizes = [2, 1], strides = [1, 1]} : vector<2x8xf32> to vector<2x1xf32>
    %6 = vector.extract_strided_slice %1 {offsets = [0, 0], sizes = [1, 128], strides = [1, 1]} : vector<8x128xf32> to vector<1x128xf32>
    %7 = vector.broadcast %5 : vector<2x1xf32> to vector<2x128xf32>
    %8 = vector.broadcast %6 : vector<1x128xf32> to vector<2x128xf32>
    %9 = arith.mulf %7, %8 : vector<2x128xf32>
    %10 = arith.addf %4, %9 : vector<2x128xf32>
    %11 = vector.extract_strided_slice %0 {offsets = [0, 1], sizes = [2, 1], strides = [1, 1]} : vector<2x8xf32> to vector<2x1xf32>
    %12 = vector.extract_strided_slice %1 {offsets = [1, 0], sizes = [1, 128], strides = [1, 1]} : vector<8x128xf32> to vector<1x128xf32>
    %13 = vector.broadcast %11 : vector<2x1xf32> to vector<2x128xf32>
    %14 = vector.broadcast %12 : vector<1x128xf32> to vector<2x128xf32>
    %15 = arith.mulf %13, %14 : vector<2x128xf32>
    %16 = arith.addf %10, %15 : vector<2x128xf32>
    %17 = vector.extract_strided_slice %0 {offsets = [0, 2], sizes = [2, 1], strides = [1, 1]} : vector<2x8xf32> to vector<2x1xf32>
    %18 = vector.extract_strided_slice %1 {offsets = [2, 0], sizes = [1, 128], strides = [1, 1]} : vector<8x128xf32> to vector<1x128xf32>
    %19 = vector.broadcast %17 : vector<2x1xf32> to vector<2x128xf32>
    %20 = vector.broadcast %18 : vector<1x128xf32> to vector<2x128xf32>
    %21 = arith.mulf %19, %20 : vector<2x128xf32>
    %22 = arith.addf %16, %21 : vector<2x128xf32>
    %23 = vector.extract_strided_slice %0 {offsets = [0, 3], sizes = [2, 1], strides = [1, 1]} : vector<2x8xf32> to vector<2x1xf32>
    %24 = vector.extract_strided_slice %1 {offsets = [3, 0], sizes = [1, 128], strides = [1, 1]} : vector<8x128xf32> to vector<1x128xf32>
    %25 = vector.broadcast %23 : vector<2x1xf32> to vector<2x128xf32>
    %26 = vector.broadcast %24 : vector<1x128xf32> to vector<2x128xf32>
    %27 = arith.mulf %25, %26 : vector<2x128xf32>
    %28 = arith.addf %22, %27 : vector<2x128xf32>
    %29 = vector.extract_strided_slice %0 {offsets = [0, 4], sizes = [2, 1], strides = [1, 1]} : vector<2x8xf32> to vector<2x1xf32>
    %30 = vector.extract_strided_slice %1 {offsets = [4, 0], sizes = [1, 128], strides = [1, 1]} : vector<8x128xf32> to vector<1x128xf32>
    %31 = vector.broadcast %29 : vector<2x1xf32> to vector<2x128xf32>
    %32 = vector.broadcast %30 : vector<1x128xf32> to vector<2x128xf32>
    %33 = arith.mulf %31, %32 : vector<2x128xf32>
    %34 = arith.addf %28, %33 : vector<2x128xf32>
    %35 = vector.extract_strided_slice %0 {offsets = [0, 5], sizes = [2, 1], strides = [1, 1]} : vector<2x8xf32> to vector<2x1xf32>
    %36 = vector.extract_strided_slice %1 {offsets = [5, 0], sizes = [1, 128], strides = [1, 1]} : vector<8x128xf32> to vector<1x128xf32>
    %37 = vector.broadcast %35 : vector<2x1xf32> to vector<2x128xf32>
    %38 = vector.broadcast %36 : vector<1x128xf32> to vector<2x128xf32>
    %39 = arith.mulf %37, %38 : vector<2x128xf32>
    %40 = arith.addf %34, %39 : vector<2x128xf32>
    %41 = vector.extract_strided_slice %0 {offsets = [0, 6], sizes = [2, 1], strides = [1, 1]} : vector<2x8xf32> to vector<2x1xf32>
    %42 = vector.extract_strided_slice %1 {offsets = [6, 0], sizes = [1, 128], strides = [1, 1]} : vector<8x128xf32> to vector<1x128xf32>
    %43 = vector.broadcast %41 : vector<2x1xf32> to vector<2x128xf32>
    %44 = vector.broadcast %42 : vector<1x128xf32> to vector<2x128xf32>
    %45 = arith.mulf %43, %44 : vector<2x128xf32>
    %46 = arith.addf %40, %45 : vector<2x128xf32>
    %47 = vector.extract_strided_slice %0 {offsets = [0, 7], sizes = [2, 1], strides = [1, 1]} : vector<2x8xf32> to vector<2x1xf32>
    %48 = vector.extract_strided_slice %1 {offsets = [7, 0], sizes = [1, 128], strides = [1, 1]} : vector<8x128xf32> to vector<1x128xf32>
    %49 = vector.broadcast %47 : vector<2x1xf32> to vector<2x128xf32>
    %50 = vector.broadcast %48 : vector<1x128xf32> to vector<2x128xf32>
    %51 = arith.mulf %49, %50 : vector<2x128xf32>
    %52 = arith.addf %46, %51 : vector<2x128xf32>
    %cst = arith.constant 0.000000e+00 : f32
    %53 = vector.broadcast %cst : f32 to vector<2x128xf32>
    %54 = arith.maximumf %52, %53 : vector<2x128xf32>
    %c0_5 = arith.constant 0 : index
    %c0_6 = arith.constant 0 : index
    %55 = vector.load %arg4[%c0_5, %c0_6] : memref<128x128xf32, #tpu.memory_space<vmem>>, vector<128x128xf32>
    %cst_7 = arith.constant dense<0.000000e+00> : vector<2x128xf32>
    %56 = tpu.matmul %54, %55, %cst_7 {dimension_numbers = #tpu.dot_dimension_numbers<[1], [0], [0], [1], [0, 0, 1, 1], [], []>} : vector<2x128xf32>, vector<128x128xf32>, vector<2x128xf32> -> vector<2x128xf32>
    %c0_8 = arith.constant 0 : index
    %c0_9 = arith.constant 0 : index
    %57 = vector.load %arg5[%c0_8, %c0_9] : memref<1x128xf32, #tpu.memory_space<vmem>>, vector<1x128xf32>
    %58 = vector.broadcast %57 : vector<1x128xf32> to vector<2x128xf32>
    %59 = arith.addf %56, %58 : vector<2x128xf32>
    %cst_10 = arith.constant 0.000000e+00 : f32
    %60 = vector.broadcast %cst_10 : f32 to vector<2x128xf32>
    %61 = arith.maximumf %59, %60 : vector<2x128xf32>
    %c0_11 = arith.constant 0 : index
    %c0_12 = arith.constant 0 : index
    %62 = vector.load %arg6[%c0_11, %c0_12] : memref<128x128xf32, #tpu.memory_space<vmem>>, vector<128x128xf32>
    %cst_13 = arith.constant dense<0.000000e+00> : vector<2x128xf32>
    %63 = tpu.matmul %61, %62, %cst_13 {dimension_numbers = #tpu.dot_dimension_numbers<[1], [0], [0], [1], [0, 0, 1, 1], [], []>} : vector<2x128xf32>, vector<128x128xf32>, vector<2x128xf32> -> vector<2x128xf32>
    %c0_14 = arith.constant 0 : index
    %c0_15 = arith.constant 0 : index
    %64 = vector.load %arg7[%c0_14, %c0_15] : memref<1x128xf32, #tpu.memory_space<vmem>>, vector<1x128xf32>
    %65 = vector.broadcast %64 : vector<1x128xf32> to vector<2x128xf32>
    %66 = arith.addf %63, %65 : vector<2x128xf32>
    %c0_16 = arith.constant 0 : index
    %c0_17 = arith.constant 0 : index
    %67 = vector.load %arg8[%c0_16, %c0_17] : memref<2x128xf32, #tpu.memory_space<vmem>>, vector<2x128xf32>
    tpu.vector_store %arg8[%c0_16, %c0_17], %66 {strides = array<i32>} : memref<2x128xf32, #tpu.memory_space<vmem>>, vector<2x128xf32>,
    return
  }
  func.func @transform_0(%arg0: i32) -> (i32, i32) {
    %c0_i32 = arith.constant 0 : i32
    %c0_i32_0 = arith.constant 0 : i32
    return %arg0, %c0_i32 : i32, i32
  }
  func.func @transform_1(%arg0: i32) -> (i32, i32) {
    %c0_i32 = arith.constant 0 : i32
    %c0_i32_0 = arith.constant 0 : i32
    %c0_i32_1 = arith.constant 0 : i32
    return %c0_i32, %c0_i32_0 : i32, i32
  }
  func.func @transform_2(%arg0: i32) -> (i32, i32) {
    %c0_i32 = arith.constant 0 : i32
    %c0_i32_0 = arith.constant 0 : i32
    %c0_i32_1 = arith.constant 0 : i32
    return %c0_i32, %c0_i32_0 : i32, i32
  }
  func.func @transform_3(%arg0: i32) -> (i32, i32) {
    %c0_i32 = arith.constant 0 : i32
    %c0_i32_0 = arith.constant 0 : i32
    %c0_i32_1 = arith.constant 0 : i32
    return %c0_i32, %c0_i32_0 : i32, i32
  }
  func.func @transform_4(%arg0: i32) -> (i32, i32) {
    %c0_i32 = arith.constant 0 : i32
    %c0_i32_0 = arith.constant 0 : i32
    %c0_i32_1 = arith.constant 0 : i32
    return %c0_i32, %c0_i32_0 : i32, i32
  }
  func.func @transform_5(%arg0: i32) -> (i32, i32) {
    %c0_i32 = arith.constant 0 : i32
    %c0_i32_0 = arith.constant 0 : i32
    %c0_i32_1 = arith.constant 0 : i32
    return %c0_i32, %c0_i32_0 : i32, i32
  }
  func.func @transform_6(%arg0: i32) -> (i32, i32) {
    %c0_i32 = arith.constant 0 : i32
    %c0_i32_0 = arith.constant 0 : i32
    %c0_i32_1 = arith.constant 0 : i32
    return %c0_i32, %c0_i32_0 : i32, i32
  }
  func.func @transform_7(%arg0: i32) -> (i32, i32) {
    %c0_i32 = arith.constant 0 : i32
    %c0_i32_0 = arith.constant 0 : i32
    return %arg0, %c0_i32 : i32, i32
  }
}

</mosaic_0001>

<bundles_post_ra>
// kernel: qnetwork_forward.1
= control target key start
LH: loop header
LB: loop body
LE: loop exit
PB: predicated region body
PF: predicated region fallthrough
CT: control target
= control target key end

     0   :  { %12 = vsyncpa [#allocation3], 0  ;;  %s485_s0 = inlined_call_operand.hbm [shape: f32[2,8], index: 0, kind: input, shape index: {}]   ;;  %s486_s1 = inlined_call_operand.hbm [shape: f32[8,128], index: 1, kind: input, shape index: {}]   ;;  %s487_s2 = inlined_call_operand.vmem [shape: f32[1,128], index: 2, kind: input, shape index: {}]   ;;  %s488_s3 = inlined_call_operand.hbm [shape: f32[128,128], index: 3, kind: input, shape index: {}]   ;;  %s489_s4 = inlined_call_operand.vmem [shape: f32[1,128], index: 4, kind: input, shape index: {}]   ;;  %s490_s5 = inlined_call_operand.hbm [shape: f32[128,128], index: 5, kind: input, shape index: {}]   ;;  %s491_s6 = inlined_call_operand.vmem [shape: f32[1,128], index: 6, kind: input, shape index: {}]   ;;  %s492_s7 = inlined_call_operand.hbm [shape: f32[2,128], index: 7, kind: output, shape index: {}]  }
   0x1   :  { %13 = vsyncpa [#allocation6], 0 }
   0x2   :  { %14 = vsyncpa [#allocation9], 0  ;;  %s32_s26 = sshll.u32 %s486_s1, 4  ;;  %s33_s26 = int_to_ptr.hbm [resolvable:$true] %s32_s26 }
   0x3   :  { %15 = vsyncpa [#allocation4], 0  ;;  %s406_s27 = smov [#allocation5]   ;;  %s21_s8 = sshll.u32 %s485_s0, 4  ;;  %s22_s8 = int_to_ptr.hbm [resolvable:$true] %s21_s8 }
   0x4   :  { %s34_s28 = sshll.u32 %s406_s27, 4  ;;  %s407_s9 = smov [#allocation2]   ;;  %s35_s28 = int_to_ptr.vmem [resolvable:$true] %s34_s28 }
   0x5   :  { %37 = dma.hbm_to_vmem [thread:$0]  %s33_s26, 128, %s35_s28, [#allocation6]  }
   0x6   :  { %s23_s10 = sshll.u32 %s407_s9, 4  ;;  %s44_s13 = sshll.u32 %s488_s3, 4  ;;  %s24_s10 = int_to_ptr.vmem [resolvable:$true] %s23_s10  ;;  %s45_s13 = int_to_ptr.hbm [resolvable:$true] %s44_s13 }
   0x7   :  { %26 = dma.hbm_to_vmem [thread:$0]  %s22_s8, 32, %s24_s10, [#allocation3]  }
   0x8   :  { %s408_s1 = smov [#allocation7]   ;;  %s59_s17 = sshll.u32 %s490_s5, 4  ;;  %s60_s17 = int_to_ptr.hbm [resolvable:$true] %s59_s17 }
   0x9   :  { %s46_s14 = sshll.u32 %s408_s1, 4  ;;  %s409_s18 = smov 128   ;;  %s47_s14 = int_to_ptr.vmem [resolvable:$true] %s46_s14 }
   0xa   :  { %s410_s0 = smov 8   ;;  %s411_s19 = smov [#allocation8]  }
   0xb   :  { %52 = dma.hbm_to_vmem [thread:$0]  %s45_s13, 2048, %s47_s14, [#allocation6], %s409_s18, %s409_s18, %s410_s0  }
   0xc   :  { %s61_s20 = sshll.u32 %s411_s19, 4  ;;  %s62_s20 = int_to_ptr.vmem [resolvable:$true] %s61_s20 }
   0xd   :  { %67 = dma.hbm_to_vmem [thread:$0]  %s60_s17, 2048, %s62_s20, [#allocation9], %s409_s18, %s409_s18, %s410_s0  }
   0xe   :  { %398 = dma.done.wait [#allocation3], 32  }
   0xf   :  { %399 = vsyncadd [#allocation3], 4294967264 }
  0x10   :  { %400 = dma.done.wait [#allocation6], 2176  }
  0x11   :  { %401 = vsyncadd [#allocation6], 4294965120 }
  0x12   :  { %402 = dma.done.wait [#allocation9], 2048  }
  0x13   :  { %403 = vsyncadd [#allocation9], 4294965248  ;;  %v412_v0 = vmov 0   ;;  %v413_v1 = vmov 2   ;;  %v414_v2 = vmov 4   ;;  %v165_v4 = vld [vmem:[#allocation7 + $0x78] sm:$0xff] }
  0x14   :  { %266 = vset.pattern.permute.xlu0 %v412_v0  ;;  %268 = vset.pattern.permute.xlu1 %v413_v1  ;;  %v86_v3 = vld [vmem:[#allocation2] sm:$0x3]  ;;  %v415_v6 = vmov 1   ;;  %v416_v7 = vmov 3   ;;  %v417_v8 = vmov 5   ;;  %v418_v9 = vmov 6  }
  0x15   :  { %270 = vset.pattern.permute.xlu2 %v414_v2  ;;  %94 = vperm.xlu0 %266, %v86_v3   ;;  %v164_v5 = vld [vmem:[#allocation7 + $0x70] sm:$0xff]  ;;  %v419_v10 = vmov 7   ;;  %v163_v11 = vld [vmem:[#allocation7 + $0x68] sm:$0xff]  ;;  %v162_v12 = vld [vmem:[#allocation7 + $0x60] sm:$0xff]  ;;  %s420_s24 = smov [#allocation10]   ;;  %s239_s28 = sshll.u32 %s492_s7, 4  ;;  %s240_s28 = int_to_ptr.hbm [resolvable:$true] %s239_s28 }
  0x16   :  { %108 = vperm.xlu1 %268, %v86_v3   ;;  %122 = vperm.xlu2 %270, %v86_v3   ;;  %v161_v13 = vld [vmem:[#allocation7 + $0x58] sm:$0xff]  ;;  %v160_v14 = vld [vmem:[#allocation7 + $0x50] sm:$0xff]  ;;  %v159_v15 = vld [vmem:[#allocation7 + $0x48] sm:$0xff]  ;;  %s237_s25 = sshll.u32 %s420_s24, 4  ;;  %s238_s25 = int_to_ptr.vmem [resolvable:$true] %s237_s25 }
  0x17   :  { %170 = vmatpush.msra.mxu0 %v165_v4  ;;  %v158_v16 = vld [vmem:[#allocation7 + $0x40] sm:$0xff]  ;;  %v157_v17 = vld [vmem:[#allocation7 + $0x38] sm:$0xff]  ;;  %v156_v18 = vld [vmem:[#allocation7 + $0x30] sm:$0xff] }
  0x18   :  { %v155_v19 = vld [vmem:[#allocation7 + $0x28] sm:$0xff]  ;;  %v154_v20 = vld [vmem:[#allocation7 + $0x20] sm:$0xff]  ;;  %v153_v21 = vld [vmem:[#allocation7 + $0x18] sm:$0xff] }
  0x19   :  { %171 = vmatpush.msra.mxu0 %v164_v5  ;;  %v152_v22 = vld [vmem:[#allocation7 + $0x10] sm:$0xff]  ;;  %v151_v23 = vld [vmem:[#allocation7 + $0x8] sm:$0xff]  ;;  %v150_v24 = vld [vmem:[#allocation7] sm:$0xff] }
  0x1a   :  { %v206_v25 = vld [vmem:[#allocation8 + $0x78] sm:$0xff]  ;;  %v205_v26 = vld [vmem:[#allocation8 + $0x70] sm:$0xff]  ;;  %v204_v28 = vld [vmem:[#allocation8 + $0x68] sm:$0xff] }
  0x1b   :  { %172 = vmatpush.msra.mxu0 %v163_v11  ;;  %211 = vmatpush.msra.mxu1 %v206_v25  ;;  %v87_v29 = vld [vmem:[#allocation5] sm:$0xff]  ;;  %v203_v32 = vld [vmem:[#allocation8 + $0x60] sm:$0xff]  ;;  %v201_v35 = vld [vmem:[#allocation8 + $0x50] sm:$0xff] }
  0x1c   :  { %v97_v33 = vperm.slane %v87_v29, 0  ;;  %v202_v34 = vld [vmem:[#allocation8 + $0x58] sm:$0xff]  ;;  %v275_v36 = vld [vmem:[%s487_s2] ss:$0 sm:$0xff]  ;;  %v104_v38 = vperm.slane %v87_v29, 1  ;;  %v200_v39 = vld [vmem:[#allocation8 + $0x48] sm:$0xff] }
  0x1d   :  { %267 = vset.pattern.permute.xlu0 %v415_v6  ;;  %173 = vmatpush.msra.mxu0 %v162_v12  ;;  %v111_v41 = vperm.slane %v87_v29, 2  ;;  %v199_v42 = vld [vmem:[#allocation8 + $0x40] sm:$0xff]  ;;  %v118_v47 = vperm.slane %v87_v29, 3  ;;  %v198_v48 = vld [vmem:[#allocation8 + $0x38] sm:$0xff]  ;;  %v125_v50 = vperm.slane %v87_v29, 4  ;;  %v197_v52 = vld [vmem:[#allocation8 + $0x30] sm:$0xff] }
  0x1e   :  { %269 = vset.pattern.permute.xlu1 %v416_v7  ;;  %101 = vperm.xlu0 %267, %v86_v3   ;;  %v132_v55 = vperm.slane %v87_v29, 5  ;;  %v196_v56 = vld [vmem:[#allocation8 + $0x28] sm:$0xff]  ;;  %v139_v57 = vperm.slane %v87_v29, 6  ;;  %v146_v60 = vperm.slane %v87_v29, 7  ;;  %v195_v61 = vld [vmem:[#allocation8 + $0x20] sm:$0xff]  ;;  %v194_v2 = vld [vmem:[#allocation8 + $0x18] sm:$0xff] }
  0x1f   :  { %115 = vperm.xlu1 %269, %v86_v3   ;;  %271 = vset.pattern.permute.xlu2 %v417_v8  ;;  %v191_v11 = vld [vmem:[#allocation8] sm:$0xff]  ;;  %v276_v12 = vld [vmem:[%s489_s4] ss:$0 sm:$0xff] }
  0x20   :  { %129 = vperm.xlu2 %271, %v86_v3   ;;  %174 = vmatpush.msra.mxu0 %v161_v13 }
  0x21   :  { %212 = vmatpush.msra.mxu1 %v205_v26 }
  0x22   :  { %175 = vmatpush.msra.mxu0 %v160_v14 }
  0x23   :  { %213 = vmatpush.msra.mxu1 %v204_v28 }
  0x24   :  { %176 = vmatpush.msra.mxu0 %v159_v15 }
  0x25   :  { %214 = vmatpush.msra.mxu1 %v203_v32 }
  0x26   :  { %274 = vset.pattern.permute.xlu0 %v419_v10  ;;  %177 = vmatpush.msra.mxu0 %v158_v16  ;;  %v277_v16 = vld [vmem:[%s491_s6] ss:$0 sm:$0xff] }
  0x27   :  { %272 = vset.pattern.permute.xlu1 %v418_v9  ;;  %215 = vmatpush.msra.mxu1 %v202_v34  ;;  %v193_v9 = vld [vmem:[#allocation8 + $0x10] sm:$0xff] }
  0x28   :  { %136 = vperm.xlu1 %272, %v86_v3   ;;  %273 = vset.pattern.permute.xlu2 %v419_v10  ;;  %v192_v10 = vld [vmem:[#allocation8 + $0x8] sm:$0xff] }
  0x29   :  { %143 = vperm.xlu2 %273, %v86_v3   ;;  %178 = vmatpush.msra.mxu0 %v157_v17 }
  0x2a   :  { %216 = vmatpush.msra.mxu1 %v201_v35 }
  0x2b   :  { %179 = vmatpush.msra.mxu0 %v156_v18 }
  0x2c   :  { %217 = vmatpush.msra.mxu1 %v200_v39 }
  0x2d   :  { %180 = vmatpush.msra.mxu0 %v155_v19 }
  0x2e   :  { %218 = vmatpush.msra.mxu1 %v199_v42 }
  0x2f   :  { %181 = vmatpush.msra.mxu0 %v154_v20 }
  0x30   :  { %219 = vmatpush.msra.mxu1 %v198_v48 }
  0x31   :  { %182 = vmatpush.msra.mxu0 %v153_v21 }
  0x32   :  { %220 = vmatpush.msra.mxu1 %v197_v52 }
  0x33   :  { %183 = vmatpush.msra.mxu0 %v152_v22 }
  0x34   :  { %221 = vmatpush.msra.mxu1 %v196_v56 }
  0x35   :  { %184 = vmatpush.msra.mxu0 %v151_v23 }
  0x36   :  { %222 = vmatpush.msra.mxu1 %v195_v61 }
  0x37   :  { %185 = vmatpush.msra.mxu0 %v150_v24 }
  0x38   :  { %223 = vmatpush.msra.mxu1 %v194_v2 }
  0x3a   :  { %224 = vmatpush.msra.mxu1 %v193_v9 }
  0x3c   :  { %225 = vmatpush.msra.mxu1 %v192_v10 }
  0x3e   :  { %226 = vmatpush.msra.mxu1 %v191_v11 }
  0x70   :  { %v123_v27 = vpop.permute.xlu2 %122 }
  0x71   :  { %v126_v58 = vmul.f32 %v125_v50, %v123_v27 }
  0x7a   :  { %v130_v40 = vpop.permute.xlu2 %129 }
  0x7b   :  { %v133_v0 = vmul.f32 %v132_v55, %v130_v40 }
  0x83   :  { %v144_v62 = vpop.permute.xlu2 %143 }
  0x84   :  { %v147_v5 = vmul.f32 %v146_v60, %v144_v62 }
  0x87   :  { %v95_v30 = vpop.permute.xlu0 %94 }
  0x88   :  { %v109_v31 = vpop.permute.xlu1 %108  ;;  %v98_v37 = vmul.f32 %v97_v33, %v95_v30 }
  0x89   :  { %v112_v49 = vmul.f32 %v111_v41, %v109_v31 }
  0x8a   :  { %v99_v45 = vadd.f32 %v275_v36, %v98_v37 }
  0x90   :  { %v102_v43 = vpop.permute.xlu0 %101 }
  0x91   :  { %v116_v44 = vpop.permute.xlu1 %115  ;;  %v105_v46 = vmul.f32 %v104_v38, %v102_v43 }
  0x92   :  { %v119_v54 = vmul.f32 %v118_v47, %v116_v44 }
  0x93   :  { %v106_v51 = vadd.f32 %v105_v46, %v99_v45 }
  0x95   :  { %v113_v53 = vadd.f32 %v112_v49, %v106_v51 }
  0x97   :  { %v120_v59 = vadd.f32 %v119_v54, %v113_v53 }
  0x99   :  { %v127_v63 = vadd.f32 %v126_v58, %v120_v59 }
  0x9a   :  { %v137_v1 = vpop.permute.xlu1 %136 }
  0x9b   :  { %v140_v3 = vmul.f32 %v139_v57, %v137_v1  ;;  %v134_v4 = vadd.f32 %v133_v0, %v127_v63 }
  0x9d   :  { %v141_v6 = vadd.f32 %v140_v3, %v134_v4 }
  0x9f   :  { %v148_v7 = vadd.f32 %v147_v5, %v141_v6 }
  0xa1   :  { %v149_v8 = vmax.f32 %v148_v7, 0.0 }
  0xa3   :  { %186 = vmatmul.f32.vlgmr.msra.gmra.mxu0 %v149_v8 }
 0x120   :  { %v187_v13 = vpop.f32.mrf.mxu0 }
 0x121   :  { %v188_v14 = vadd.f32 %v276_v12, %v187_v13 }
 0x123   :  { %v190_v15 = vmax.f32 %v188_v14, 0.0 }
 0x125   :  { %227 = vmatmul.f32.vlgmr.msra.gmra.mxu1 %v190_v15 }
 0x1a2   :  { %v228_v17 = vpop.f32.mrf.mxu1 }
 0x1a3   :  { %v229_v18 = vadd.f32 %v277_v16, %v228_v17 }
 0x1a5   :  { %231 = vst [vmem:[#allocation10] sm:$0x3] %v229_v18 }
 0x1a6   :  { %242 = dma.vmem_to_hbm [thread:$0]  %s238_s25, 32, %s240_s28, [#allocation4]  }
 0x1a7   :  { %404 = dma.done.wait [#allocation4], 32  }
 0x1a8   :  { %405 = vsyncadd [#allocation4], 4294967264 }
 0x1a9   :  { %247 = vsyncpa [#allocation3], 1 }
 0x1aa   :  { %248 = vsyncpa [#allocation6], 1 }
 0x1ab   :  { %249 = vsyncpa [#allocation9], 1 }
 0x1ac   :  { %250 = vsyncpa [#allocation4], 1 }

</bundles_post_ra>
